<compile_context>
chip_gen: v5e
topology: v5e:2x2
jax: 0.10.0
libtpu: 0.0.40
codegen_flags: <defaults>
</compile_context>

<pallas_src>
import functools

import jax
import jax.numpy as jnp
from jax.experimental import pallas as pl
from jax.experimental.pallas import tpu as pltpu


def _cdiv(a, b):
    return -(-a // b)


def _round_up(x, m):
    return ((x + m - 1) // m) * m


def _wfree_kernel(x_ref, o_ref, acc_ref, *, inv_e, n_experts, te):
    # x_ref: (1, TE, TH, W); o_ref: (1, TH, W); acc_ref: (TH, W) f32 scratch.
    e_blk = pl.program_id(2)

    @pl.when(e_blk == 0)
    def _init():
        acc_ref[...] = jnp.zeros_like(acc_ref)

    ragged = (n_experts % te) != 0
    # Slab-by-slab accumulation over this block's experts: per-lane VPU adds,
    # live set = accumulator + one (TH, W) slab (no E+1 f32 copies of the tile).
    for e_local in range(te):
        def _add(e_local=e_local):
            acc_ref[...] += x_ref[0, e_local, :, :].astype(jnp.float32)
        if ragged:
            # Mask out padded experts in the last (partial) expert block.
            pl.when(e_blk * te + e_local < n_experts)(_add)
        else:
            _add()

    @pl.when(e_blk == pl.num_programs(2) - 1)
    def _finalize():
        o_ref[...] = (acc_ref[...] * inv_e).astype(o_ref.dtype)[None]


def _vmem_limit_bytes():
    """Generation-aware scoped-VMEM limit (v5e/v6e: 128 MiB phys, v7x: 64 MiB)."""
    try:
        cap = int(pltpu.get_tpu_info().vmem_capacity_bytes)
    except Exception:
        cap = 64 * 1024 * 1024  # conservative fallback (v7x physical VMEM)
    # 3/4 of physical capacity, capped at 96 MiB: ~48 MiB on v7x, 96 MiB on
    # v5e/v6e (both well above their 16/32 MiB default scoped limits).
    return min(cap * 3 // 4, 96 * 1024 * 1024)


def _choose_tiles(B, E, H, W, itemsize, in_block_budget):
    """Pick (TE, TH). W stays full (lane axis). TH is a multiple of 8 or the
    full H extent. TE <= E; the expert axis is only split when even an
    8-row tile of all experts exceeds the per-block VMEM budget."""
    if E * H * W * itemsize <= in_block_budget:
        te, th = E, H                                    # everything in one block
    else:
        # Shrink TH first (keeps the whole reduction in one grid step).
        th = (in_block_budget // (E * W * itemsize)) // 8 * 8
        if th >= 8:
            te, th = E, min(th, H)
        else:
            # Split the expert (reduction) axis too; keep TH at >= 8 rows.
            th = min(H, 8)
            te = max(1, in_block_budget // (th * W * itemsize))
            te = min(te, E)
            # TODO(synk): if a single (8, W) expert slab still exceeds the
            # budget (enormous W), tile W as well.
    te = min(te, 128)  # bound per-block unroll length / trace size

    # Megacore balance (v7x: 2 TensorCores): prefer >= 4 parallel blocks when
    # the H axis can be split into multiple-of-8 tiles.
    if B * _cdiv(H, th) < 4 and H >= 16 and th > 8:
        want_h_tiles = _cdiv(4, max(B, 1))
        cand = max(8, _round_up(_cdiv(H, want_h_tiles), 8))
        if cand < th:
            th = cand
    return te, th


def wfree_forward(x):
    """Mean over dim=1. x: [B, E, H, W] -> [B, H, W]."""
    B, E, H, W = x.shape
    itemsize = x.dtype.itemsize
    vmem_limit = _vmem_limit_bytes()
    # One input block is double-buffered; keep 1/3 of the limit as headroom
    # for the output double buffer, f32 accumulator and internal scratch.
    te, th = _choose_tiles(B, E, H, W, itemsize, in_block_budget=vmem_limit // 3)

    grid = (B, _cdiv(H, th), _cdiv(E, te))

    in_bytes = B * E * H * W * itemsize
    out_bytes = B * H * W * itemsize

    kernel = functools.partial(_wfree_kernel, inv_e=1.0 / E, n_experts=E, te=te)
    out = pl.pallas_call(
        kernel,
        out_shape=jax.ShapeDtypeStruct((B, H, W), x.dtype),
        grid=grid,
        in_specs=[pl.BlockSpec((1, te, th, W), lambda b, h, e: (b, e, h, 0))],
        out_specs=pl.BlockSpec((1, th, W), lambda b, h, e: (b, h, 0)),
        scratch_shapes=[pltpu.VMEM((th, W), jnp.float32)],
        compiler_params=pltpu.CompilerParams(
            dimension_semantics=("parallel", "parallel", "arbitrary"),
            vmem_limit_bytes=vmem_limit,
        ),
        cost_estimate=pl.CostEstimate(
            flops=B * E * H * W,          # ~1 add per input element
            transcendentals=0,
            bytes_accessed=in_bytes + out_bytes,
        ),
    )(x)
    return out


if __name__ == "__main__":
    # WFree has no learnable parameters (the pooling op is parameter-free).
    key = jax.random.PRNGKey(0)
    B, E, H, W = 2, 4, 16, 16
    x = jax.random.normal(key, (B, E, H, W), dtype=jnp.float32)

    out = jax.block_until_ready(wfree_forward(x))

    # Reference check against plain JAX mean over dim=1.
    ref = jnp.mean(x, axis=1)
    assert out.shape == (B, H, W)
    assert jnp.allclose(out, ref, atol=1e-6, rtol=1e-6)

    print("KERNEL_OK")
</pallas_src>

<mosaic_0001>
module attributes {stable_mosaic.version = 11 : i64} {
  func.func @_wfree_kernel(%arg0: i32, %arg1: i32, %arg2: i32, %arg3: memref<1x4x8x16xf32, #tpu.memory_space<vmem>>, %arg4: memref<1x8x16xf32, #tpu.memory_space<vmem>>, %arg5: memref<8x16xf32, #tpu.memory_space<vmem>>) attributes {dimension_semantics = [#tpu.dimension_semantics<parallel>, #tpu.dimension_semantics<parallel>, #tpu.dimension_semantics<arbitrary>], iteration_bounds = array<i64: 2, 2, 1>, scalar_prefetch = 0 : i64, scratch_operands = 1 : i64, tpu.core_type = #tpu.core_type<tc>, window_params = [{transform_indices = @transform_0, window_bounds = array<i64: 1, 4, 8, 16>}, {transform_indices = @transform_1, window_bounds = array<i64: 1, 8, 16>}]} {
    %c0_i32 = arith.constant 0 : i32
    %0 = arith.cmpi eq, %arg2, %c0_i32 : i32
    %1 = arith.extui %0 : i1 to i32
    %c0_i32_0 = arith.constant 0 : i32
    %2 = arith.cmpi ne, %1, %c0_i32_0 : i32
    scf.if %2 {
      %cst = arith.constant 0.000000e+00 : f32
      %26 = vector.broadcast %cst : f32 to vector<8x16xf32>
      %c0_31 = arith.constant 0 : index
      %c0_32 = arith.constant 0 : index
      %27 = vector.load %arg5[%c0_31, %c0_32] : memref<8x16xf32, #tpu.memory_space<vmem>>, vector<8x16xf32>
      tpu.vector_store %arg5[%c0_31, %c0_32], %26 {strides = array<i32>} : memref<8x16xf32, #tpu.memory_space<vmem>>, vector<8x16xf32>,
    } else {
    }
    %c0 = arith.constant 0 : index
    %c0_1 = arith.constant 0 : index
    %3 = vector.load %arg5[%c0, %c0_1] : memref<8x16xf32, #tpu.memory_space<vmem>>, vector<8x16xf32>
    %c0_2 = arith.constant 0 : index
    %c0_3 = arith.constant 0 : index
    %c0_4 = arith.constant 0 : index
    %c0_5 = arith.constant 0 : index
    %4 = vector.load %arg3[%c0_2, %c0_3, %c0_4, %c0_5] : memref<1x4x8x16xf32, #tpu.memory_space<vmem>>, vector<1x1x8x16xf32>
    %5 = vector.shape_cast %4 : vector<1x1x8x16xf32> to vector<8x16xf32>
    %6 = arith.addf %3, %5 : vector<8x16xf32>
    %c0_6 = arith.constant 0 : index
    %c0_7 = arith.constant 0 : index
    %7 = vector.load %arg5[%c0_6, %c0_7] : memref<8x16xf32, #tpu.memory_space<vmem>>, vector<8x16xf32>
    tpu.vector_store %arg5[%c0_6, %c0_7], %6 {strides = array<i32>} : memref<8x16xf32, #tpu.memory_space<vmem>>, vector<8x16xf32>,
    %c0_8 = arith.constant 0 : index
    %c0_9 = arith.constant 0 : index
    %8 = vector.load %arg5[%c0_8, %c0_9] : memref<8x16xf32, #tpu.memory_space<vmem>>, vector<8x16xf32>
    %c0_10 = arith.constant 0 : index
    %c1 = arith.constant 1 : index
    %c0_11 = arith.constant 0 : index
    %c0_12 = arith.constant 0 : index
    %9 = vector.load %arg3[%c0_10, %c1, %c0_11, %c0_12] : memref<1x4x8x16xf32, #tpu.memory_space<vmem>>, vector<1x1x8x16xf32>
    %10 = vector.shape_cast %9 : vector<1x1x8x16xf32> to vector<8x16xf32>
    %11 = arith.addf %8, %10 : vector<8x16xf32>
    %c0_13 = arith.constant 0 : index
    %c0_14 = arith.constant 0 : index
    %12 = vector.load %arg5[%c0_13, %c0_14] : memref<8x16xf32, #tpu.memory_space<vmem>>, vector<8x16xf32>
    tpu.vector_store %arg5[%c0_13, %c0_14], %11 {strides = array<i32>} : memref<8x16xf32, #tpu.memory_space<vmem>>, vector<8x16xf32>,
    %c0_15 = arith.constant 0 : index
    %c0_16 = arith.constant 0 : index
    %13 = vector.load %arg5[%c0_15, %c0_16] : memref<8x16xf32, #tpu.memory_space<vmem>>, vector<8x16xf32>
    %c0_17 = arith.constant 0 : index
    %c2 = arith.constant 2 : index
    %c0_18 = arith.constant 0 : index
    %c0_19 = arith.constant 0 : index
    %14 = vector.load %arg3[%c0_17, %c2, %c0_18, %c0_19] : memref<1x4x8x16xf32, #tpu.memory_space<vmem>>, vector<1x1x8x16xf32>
    %15 = vector.shape_cast %14 : vector<1x1x8x16xf32> to vector<8x16xf32>
    %16 = arith.addf %13, %15 : vector<8x16xf32>
    %c0_20 = arith.constant 0 : index
    %c0_21 = arith.constant 0 : index
    %17 = vector.load %arg5[%c0_20, %c0_21] : memref<8x16xf32, #tpu.memory_space<vmem>>, vector<8x16xf32>
    tpu.vector_store %arg5[%c0_20, %c0_21], %16 {strides = array<i32>} : memref<8x16xf32, #tpu.memory_space<vmem>>, vector<8x16xf32>,
    %c0_22 = arith.constant 0 : index
    %c0_23 = arith.constant 0 : index
    %18 = vector.load %arg5[%c0_22, %c0_23] : memref<8x16xf32, #tpu.memory_space<vmem>>, vector<8x16xf32>
    %c0_24 = arith.constant 0 : index
    %c3 = arith.constant 3 : index
    %c0_25 = arith.constant 0 : index
    %c0_26 = arith.constant 0 : index
    %19 = vector.load %arg3[%c0_24, %c3, %c0_25, %c0_26] : memref<1x4x8x16xf32, #tpu.memory_space<vmem>>, vector<1x1x8x16xf32>
    %20 = vector.shape_cast %19 : vector<1x1x8x16xf32> to vector<8x16xf32>
    %21 = arith.addf %18, %20 : vector<8x16xf32>
    %c0_27 = arith.constant 0 : index
    %c0_28 = arith.constant 0 : index
    %22 = vector.load %arg5[%c0_27, %c0_28] : memref<8x16xf32, #tpu.memory_space<vmem>>, vector<8x16xf32>
    tpu.vector_store %arg5[%c0_27, %c0_28], %21 {strides = array<i32>} : memref<8x16xf32, #tpu.memory_space<vmem>>, vector<8x16xf32>,
    %c0_i32_29 = arith.constant 0 : i32
    %23 = arith.cmpi eq, %arg2, %c0_i32_29 : i32
    %24 = arith.extui %23 : i1 to i32
    %c0_i32_30 = arith.constant 0 : i32
    %25 = arith.cmpi ne, %24, %c0_i32_30 : i32
    scf.if %25 {
      %c0_31 = arith.constant 0 : index
      %c0_32 = arith.constant 0 : index
      %26 = vector.load %arg5[%c0_31, %c0_32] : memref<8x16xf32, #tpu.memory_space<vmem>>, vector<8x16xf32>
      %cst = arith.constant 2.500000e-01 : f32
      %27 = vector.broadcast %cst : f32 to vector<8x16xf32>
      %28 = arith.mulf %26, %27 : vector<8x16xf32>
      %29 = vector.shape_cast %28 : vector<8x16xf32> to vector<1x8x16xf32>
      %c0_33 = arith.constant 0 : index
      %c0_34 = arith.constant 0 : index
      %c0_35 = arith.constant 0 : index
      %30 = vector.load %arg4[%c0_33, %c0_34, %c0_35] : memref<1x8x16xf32, #tpu.memory_space<vmem>>, vector<1x8x16xf32>
      tpu.vector_store %arg4[%c0_33, %c0_34, %c0_35], %29 {strides = array<i32>} : memref<1x8x16xf32, #tpu.memory_space<vmem>>, vector<1x8x16xf32>,
    } else {
    }
    return
  }
  func.func @transform_0(%arg0: i32, %arg1: i32, %arg2: i32) -> (i32, i32, i32, i32) {
    %c0_i32 = arith.constant 0 : i32
    %c0_i32_0 = arith.constant 0 : i32
    return %arg0, %arg2, %arg1, %c0_i32 : i32, i32, i32, i32
  }
  func.func @transform_1(%arg0: i32, %arg1: i32, %arg2: i32) -> (i32, i32, i32) {
    %c0_i32 = arith.constant 0 : i32
    %c0_i32_0 = arith.constant 0 : i32
    return %arg0, %arg1, %c0_i32 : i32, i32, i32
  }
}

</mosaic_0001>

<bundles_post_ra>
// kernel: tpu_custom_call.1
= control target key start
LH: loop header
LB: loop body
LE: loop exit
PB: predicated region body
PF: predicated region fallthrough
CT: control target
= control target key end

     0   :  { %6 = vsyncpa [#allocation4], 0  ;;  %s700_s0 = inlined_call_operand.hbm [shape: f32[2,4,16,16], index: 0, kind: input, shape index: {}]   ;;  %s701_s1 = inlined_call_operand.hbm [shape: f32[2,16,16], index: 1, kind: output, shape index: {}]  }
   0x1   :  { %8 = vsyncpa [#allocation4 + $0x1], 0 }
   0x2   :  { %9 = vsyncpa [#allocation5], 0 }
   0x3   :  { %11 = vsyncpa [#allocation5 + $0x1], 0  ;;  %s551_s6 = smov 0   ;;  %s553_s7 = smov 0  }
   0x4   :  { %s555_s8 = smov 0   ;;  %s557_s9 = smov 0  }
   0x5   :  { %s559_s10 = smov 0   ;;  %s561_s11 = smov 0  }
   0x6   :  { %s563_s12 = smov 0   ;;  %s565_s13 = smov 0  }
   0x7 LB: > { %s307_s14 = sadd.s32 4294967295, %s535_s13   ;;  %s308_s15 = sadd.s32 4294967294, %s535_s13   ;;  %s535_s13 = sphi %s565_s13, %s17_s13   ;;  %s531_s12 = sphi %s563_s12, %s715_s12   ;;  %s527_s11 = sphi %s561_s11, %s714_s11   ;;  %s523_s10 = sphi %s559_s10, %s713_s10   ;;  %s519_s9 = sphi %s557_s9, %s712_s9   ;;  %s515_s8 = sphi %s555_s8, %s711_s8   ;;  %s511_s7 = sphi %s553_s7, %s710_s7   ;;  %s507_s6 = sphi %s551_s6, %s709_s6  }
   0x8   : > { %s32_s16 = sadd.s32 1, %s527_s11  ;;  %s36_s17 = sadd.s32 1, %s531_s12 }
   0x9   : > { %p34_p0 = scmp.ge.s32.totalorder %s32_s16, 2  ;;  %s47_s18 = sadd.s32 1, %s515_s8 }
   0xa   : > { %p54_p1 = scmp.ne.s32.totalorder %s515_s8, %s511_s7  ;;  %p55_p2 = scmp.eq.s32.totalorder %s535_s13, 0 }
   0xb   : > { %s717_s16 = smov (%p34_p0, %s32_s16), 0  ;;  %s719_s17 = smov (!%p34_p0, %s36_s17), %s531_s12 }
   0xc   : > { %s43_s19 = ssub.s32 %s527_s11, %s717_s16  ;;  %p604_p3 = por %p55_p2, %p54_p1 }
   0xd   : > { %p38_p4 = scmp.ge.s32.totalorder %s719_s17, 2  ;;  %p60_p5 = scmp.ne.s32.totalorder %s511_s7, %s507_s6 }
   0xe   : > { %p61_p6 = scmp.eq.s32.totalorder %s307_s14, 0  ;;  %p86_p7 = scmp.eq.s32.totalorder %s307_s14, 3 }
   0xf   : > { %s721_s17 = smov (%p38_p4, %s719_s17), 0  ;;  %p92_p10 = scmp.eq.s32.totalorder %s308_s15, 3 }
  0x10   : > { %704 = sst [smem:[#allocation9_spill]] %s721_s17  ;;  %p612_p8 = por %p61_p6, %p60_p5 }
  0x11   : > { %p616_p9 = por %p86_p7, %p54_p1  ;;  %s40_s23 = ssub.s32 %s531_s12, %s721_s17 }
  0x12   : > { %s44_s24 = sor.u32 %s43_s19, %s40_s23  ;;  %p622_p12 = por %p92_p10, %p60_p5 }
  0x13   : > { %p45_p11 = scmp.eq.s32.totalorder %s44_s24, 0  ;;  %p337_p13 = scmp.lt.s32.totalorder %s535_s13, 4 }
  0x14   : > { %s112_s26 = sand.u32 1, %s515_s8   ;;  %s312_s29 = sshll.u32 %s531_s12, 3 }
  0x15   : > { %s629_s27 = scalar_select %p45_p11, %s515_s8, %s47_s18  }
  0x16   : > { %s311_s28 = sshll.u32 %s112_s26, 5  ;;  %s123_s30 = sadd.s32 %s527_s11, %s312_s29 }
  0x17   : > { %s116_s2 = scalar_lea.vmem [#allocation3], %s311_s28  ;;  %s313_s4 = sshll.u32 %s123_s30, 3 }
  0x18   : > { %s128_s3 = sshll.u32 %s116_s2, 4  ;;  %s125_s15 = scalar_lea.hbm %s700_s0, %s313_s4  ;;  %s129_s3 = int_to_ptr.vmem [resolvable:$true] %s128_s3 }
  0x19   : > { %p330_p0 = pnand %p337_p13, %p604_p3  ;;  %s126_s19 = sshll.u32 %s125_s15, 4  ;;  %s127_s19 = int_to_ptr.hbm [resolvable:$true] %s126_s19 }
  0x1a   : > { %s113_s23 = scalar_lea.sflag [#allocation4], %s112_s26  ;;  %s537_s18 = smov 256  }
  0x1b   : > { %s538_s24 = smov 128   ;;  %s539_s17 = smov 8  }
  0x1c   : > { %332 = dma.hbm_to_vmem [thread:$0]  (!%p330_p0), %s127_s19, 512, %s129_s3, %s113_s23, %s537_s18, %s538_s24, %s539_s17  }
  0x1d   : > { %p314_p1 = scmp.ge.s32.totalorder %s535_s13, 1  ;;  %p136_p2 = scmp.lt.s32.totalorder %s535_s13, 5 }
  0x1f   : > { %p137_p4 = pnand %p314_p1, %p136_p2 }
  0x20   : > { %s641_s28 = sand.u32 (!%p137_p4), 1, %s511_s7  }
  0x21   : > { %140 = sbr.rel (%p137_p4) target bundleno = 93 (0x5d), region = 24  ;;  %s315_s29 = sshll.u32 (!%p137_p4), %s641_s28, 5 }
  0x22   : > { %s143_s20 = scalar_lea.sflag (!%p137_p4), [#allocation4], %s641_s28  ;;  %s146_s30 = scalar_lea.vmem (!%p137_p4), [#allocation3], %s315_s29 }
  0x26   : > { %498 = dma.done.wait (%p612_p8), %s143_s20, 512  }
  0x27   : > { %500 = vsyncadd (%p612_p8), %s143_s20, 4294966784  ;;  %vm171_vm0 = vcmask 130048   ;;  %v540_v0 = vmov 0.0   ;;  %v174_v1 = vld [vmem:[%s146_s30] sm:$0xff]  ;;  %v317_v4 = vld [vmem:[%s146_s30 + $0x8] sm:$0xff]  ;;  %s321_s17 = sshll.u32 %s523_s10, 1 }
  0x28   : > { %172 = vst.msk [vmem:[#allocation2] sm:$0xff] %vm171_vm0, %v540_v0  ;;  %v318_v7 = vld [vmem:[%s146_s30 + $0x10] sm:$0xff]  ;;  %v319_v10 = vld [vmem:[%s146_s30 + $0x18] sm:$0xff]  ;;  %s210_s21 = sadd.s32 %s519_s9, %s321_s17  ;;  %s316_s26 = sshll.u32 %s641_s28, 3 }
  0x29   : > { %s322_s2 = sshll.u32 %s210_s21, 3  ;;  %s165_s14 = scalar_lea.vmem [#allocation6], %s316_s26 }
  0x2a   : > { %s212_s5 = scalar_lea.hbm %s701_s1, %s322_s2  ;;  %s214_s15 = sshll.u32 %s165_s14, 4  ;;  %s215_s15 = int_to_ptr.vmem [resolvable:$true] %s214_s15 }
  0x2b   : > { %s216_s19 = sshll.u32 %s212_s5, 4  ;;  %s200_s9 = scalar_lea.sflag [#allocation5], %s641_s28  ;;  %s217_s19 = int_to_ptr.hbm [resolvable:$true] %s216_s19 }
  0x2c   : > { %s451_s10 = sshra.s32 %s217_s19, 4  ;;  %s457_s29 = scalar_lea.hbm %s701_s1, 32  ;;  %s452_s10 = int_to_ptr.hbm [resolvable:$true] %s451_s10 }
  0x2d   : > { %s453_s23 = scalar_lea.hbm %s452_s10, 8  ;;  %p458_p7 = scmp.lt.s32.totalorder %s452_s10, %s701_s1 }
  0x2e   : > { %p454_p3 = scmp.ne.s32.totalorder %s452_s10, %s453_s23  ;;  %p459_p8 = scmp.lt.s32.totalorder %s457_s29, %s453_s23 }
  0x2f   : > { %v173_v2 = vld [vmem:[#allocation2] sm:$0xff] }
  0x30   : > { %v175_v3 = vadd.f32 %v174_v1, %v173_v2  ;;  %p455_p5 = pnand %p454_p3, %p616_p9  ;;  %p460_p10 = por %p459_p8, %p458_p7 }
  0x32   : > { %177 = vst.msk [vmem:[#allocation2] sm:$0xff] %vm171_vm0, %v175_v3  ;;  %p456_p6 = pneg %p455_p5 }
  0x34   : > { %p461_p11 = pnand %p460_p10, %p456_p6 }
  0x39   : > { %v178_v5 = vld [vmem:[#allocation2] sm:$0xff] }
  0x3a   : > { %v181_v6 = vadd.f32 %v317_v4, %v178_v5 }
  0x3c   : > { %182 = vst.msk [vmem:[#allocation2] sm:$0xff] %vm171_vm0, %v181_v6 }
  0x43   : > { %v183_v8 = vld [vmem:[#allocation2] sm:$0xff] }
  0x44   : > { %v186_v9 = vadd.f32 %v318_v7, %v183_v8 }
  0x46   : > { %187 = vst.msk [vmem:[#allocation2] sm:$0xff] %vm171_vm0, %v186_v9 }
  0x4d   : > { %v188_v11 = vld [vmem:[#allocation2] sm:$0xff] }
  0x4e   : > { %v191_v12 = vadd.f32 %v319_v10, %v188_v11 }
  0x50   : > { %192 = vst.msk [vmem:[#allocation2] sm:$0xff] %vm171_vm0, %v191_v12 }
  0x57   : > { %v196_v13 = vld [vmem:[#allocation2] sm:$0xff] }
  0x58   : > { %v197_v14 = vmul.f32 0.25, %v196_v13 }
  0x5a   : > { %198 = vst.msk [vmem:[%s165_s14] sm:$0xff] %vm171_vm0, %v197_v14 }
  0x5b   : > { %464 = shalt.err (!%p461_p11)
}
  0x5c   : > { %327 = dma.vmem_to_hbm [thread:$0]  (%p616_p9), %s215_s15, 128, %s217_s19, %s200_s9  }
  0x5d PF: > { %p338_p13 = scmp.ge.s32.totalorder %s535_s13, 2  ;;  %s228_s28 = sand.u32 1, %s507_s6  }
  0x5e   : > { %s229_s17 = scalar_lea.sflag [#allocation5], %s228_s28 }
  0x5f   : > { %p334_p0 = pnand %p338_p13, %p622_p12 }
  0x61   : > { %p335_p1 = pneg %p334_p0 }
  0x63   : > { %502 = dma.done.wait (%p335_p1), %s229_s17, 128  }
  0x64   : > { %504 = vsyncadd (%p335_p1), %s229_s17, 4294967168  ;;  %s17_s13 = sadd.s32 1, %s535_s13   ;;  %s708_s22 = sld [smem:[#allocation9_spill]] }
  0x65   : > { %p14_p2 = scmp.ge.s32.totalorder %s17_s13, 6   ;;  %s709_s6 = smov %s511_s7 }
  0x66   : > { %s710_s7 = smov %s515_s8  ;;  %s711_s8 = smov %s629_s27 }
  0x67   : > { %s712_s9 = smov %s527_s11  ;;  %s713_s10 = smov %s531_s12 }
  0x68   : > { %s714_s11 = smov %s717_s16  ;;  %16 = sbr.rel (!%p14_p2) target bundleno = 7 (0x7), region = 80 }
  0x6a   : > { %s715_s12 = smov %s708_s22 }
  0x6d   :  { %235 = vsyncpa [#allocation4], 1 }
  0x6e   :  { %237 = vsyncpa [#allocation4 + $0x1], 1 }
  0x6f   :  { %238 = vsyncpa [#allocation5], 1 }
  0x70   :  { %240 = vsyncpa [#allocation5 + $0x1], 1 }

</bundles_post_ra>
